<compile_context>
chip_gen: v7x
topology: tpu7x:2x2x1
jax: 0.10.0
libtpu: 0.0.40
codegen_flags: <defaults>
</compile_context>

<pallas_src>
import functools

import jax
import jax.numpy as jnp
from jax.experimental import pallas as pl
from jax.experimental.pallas import tpu as pltpu

LANES = 128
MAX_TILE_ROWS = 8192       # 8192*128*4B = 4 MiB per f32 input block
BETA = 1.0                 # PyTorch F.smooth_l1_loss default


def _num_tensorcores():
    """TensorCores per chip (2 on v7x, 1 on v5e/v6e).  Defensive probe."""
    try:
        info = pltpu.get_tpu_info()
        for attr in ("num_cores", "core_count", "num_tensorcores",
                     "tensorcore_count", "cores_per_chip"):
            v = getattr(info, attr, None)
            if v:
                return int(v)
    except Exception:
        pass
    return 1


def _smooth_l1_partial_kernel(pred_ref, tgt_ref, out_ref, acc_ref, *,
                              tile_rows, nb_per_core, total_rows, sub,
                              tail_possible):
    i = pl.program_id(1)

    @pl.when(i == 0)
    def _():
        acc_ref[...] = jnp.zeros_like(acc_ref)

    # Cast to f32 in-kernel (VPU); HBM traffic stays at the input's native width.
    p = pred_ref[...].astype(jnp.float32)
    t = tgt_ref[...].astype(jnp.float32)
    d = p - t
    ad = jnp.abs(d)
    # Branchless Huber (beta = 1.0):
    #   |d| <  beta : q=|d|   -> 0.5*d^2
    #   |d| >= beta : q=beta  -> |d| - 0.5*beta
    q = jnp.minimum(ad, BETA)
    loss = q * (ad - 0.5 * q)

    def accumulate(x):
        if sub == 8:
            # (T,128) -> (T//8, 8, 128) is a free layout-preserving reshape;
            # the axis-0 sum is pure VPU adds across vregs (no XLU).
            acc_ref[...] += x.reshape(-1, 8, LANES).sum(axis=0)
        else:
            acc_ref[...] += jnp.sum(x, axis=0, keepdims=True)

    if not tail_possible:
        # Statically known: every block is full and in range -> no mask work.
        accumulate(loss)
    else:
        # Logical (unclamped) block index: covers (a) partial last block and
        # (b) this core-split's clamped duplicate "extra" blocks.
        blk = pl.program_id(0) * nb_per_core + i
        row0 = blk * tile_rows
        is_tail = row0 + tile_rows > total_rows

        @pl.when(jnp.logical_not(is_tail))
        def _():
            accumulate(loss)

        @pl.when(is_tail)
        def _():
            rows = row0 + jax.lax.broadcasted_iota(jnp.int32, loss.shape, 0)
            accumulate(jnp.where(rows < total_rows, loss, 0.0))

    @pl.when(i == pl.num_programs(1) - 1)
    def _():
        out_ref[0] = acc_ref[...]


def _smooth_l1_partial_sums(pred_2d, tgt_2d):
    total_rows = pred_2d.shape[0]
    tile_rows = total_rows if total_rows <= MAX_TILE_ROWS else MAX_TILE_ROWS
    nb = pl.cdiv(total_rows, tile_rows)

    # Core split only when it is real work-sharing (>= 2 blocks) and the chip
    # actually has multiple TensorCores (v7x).  Single-TC chips keep 1 split.
    n_splits = _num_tensorcores() if nb >= 2 else 1
    n_splits = max(1, min(int(n_splits), nb))
    nb_per_core = pl.cdiv(nb, n_splits)

    sub = 8 if tile_rows % 8 == 0 else 1
    tail_possible = (total_rows % tile_rows != 0) or (n_splits * nb_per_core != nb)

    kernel = functools.partial(
        _smooth_l1_partial_kernel,
        tile_rows=tile_rows,
        nb_per_core=nb_per_core,
        total_rows=total_rows,
        sub=sub,
        tail_possible=tail_possible,
    )

    def in_map(c, i):
        # Clamp so we never DMA a fully out-of-range block; the kernel's row
        # mask (computed from the *unclamped* index) zeroes it out.
        return (jnp.minimum(c * nb_per_core + i, nb - 1), 0)

    bytes_in = (pred_2d.size * pred_2d.dtype.itemsize
                + tgt_2d.size * tgt_2d.dtype.itemsize)

    return pl.pallas_call(
        kernel,
        out_shape=jax.ShapeDtypeStruct((n_splits, sub, LANES), jnp.float32),
        grid_spec=pltpu.PrefetchScalarGridSpec(
            num_scalar_prefetch=0,
            grid=(n_splits, nb_per_core),
            in_specs=[
                pl.BlockSpec((tile_rows, LANES), in_map),
                pl.BlockSpec((tile_rows, LANES), in_map),
            ],
            out_specs=pl.BlockSpec((1, sub, LANES), lambda c, i: (c, 0, 0)),
            scratch_shapes=[pltpu.VMEM((sub, LANES), jnp.float32)],
        ),
        compiler_params=pltpu.CompilerParams(
            dimension_semantics=(
                "parallel" if n_splits > 1 else "arbitrary",
                "arbitrary",
            ),
        ),
        cost_estimate=pl.CostEstimate(
            flops=6 * pred_2d.size,
            transcendentals=0,
            bytes_accessed=bytes_in + n_splits * sub * LANES * 4,
        ),
    )(pred_2d, tgt_2d)


def _huber_sum_ref(p, t):
    d = p.astype(jnp.float32) - t.astype(jnp.float32)
    ad = jnp.abs(d)
    q = jnp.minimum(ad, BETA)
    return jnp.sum(q * (ad - 0.5 * q))


def smooth_l1_loss(pred, target):
    """Matches SmoothL1Loss.forward: optional one-hot of a 1-D integer target,
    then F.smooth_l1_loss(pred, target) with beta=1.0, reduction='mean'."""
    if pred.ndim > 1 and target.ndim == 1:
        # TODO(synk): fuse the one-hot into the kernel via scalar-prefetched
        # labels (SMEM) + in-kernel column iota to avoid materializing a
        # pred-sized f32 target in HBM on the classification path.
        target = jax.nn.one_hot(target, pred.shape[1], dtype=jnp.float32)

    n = pred.size
    pred_f = pred.reshape(-1)            # free (bitcast) reshape, native dtype
    tgt_f = target.reshape(-1)

    rem = n % LANES
    rows = (n - rem) // LANES

    total = jnp.float32(0.0)
    if rows > 0:
        if rem:
            pred_main = jax.lax.slice(pred_f, (0,), (rows * LANES,))
            tgt_main = jax.lax.slice(tgt_f, (0,), (rows * LANES,))
        else:
            pred_main, tgt_main = pred_f, tgt_f
        partials = _smooth_l1_partial_sums(
            pred_main.reshape(rows, LANES), tgt_main.reshape(rows, LANES))
        total = total + jnp.sum(partials)
    if rem:
        # <128 trailing elements: trivial plain-JAX sum (no pad, no extra pass).
        p_tail = jax.lax.slice(pred_f, (rows * LANES,), (n,))
        t_tail = jax.lax.slice(tgt_f, (rows * LANES,), (n,))
        total = total + _huber_sum_ref(p_tail, t_tail)

    return total / jnp.float32(n)        # mean reduction


if __name__ == "__main__":
    key = jax.random.PRNGKey(0)
    k1, k2, k3, k4, k5, k6 = jax.random.split(key, 6)

    # Case 1: pred/target same shape (regression-style), NCHW-shaped tensors.
    pred = jax.random.normal(k1, (2, 4, 16, 16), dtype=jnp.float32)
    target = jax.random.normal(k2, (2, 4, 16, 16), dtype=jnp.float32)
    loss1 = jax.block_until_ready(smooth_l1_loss(pred, target))

    # Case 2: 2-D pred with 1-D integer target -> one-hot path (lane-aligned).
    logits = jax.random.normal(k3, (8, 16), dtype=jnp.float32)
    labels = jax.random.randint(k4, (8,), 0, 16)
    loss2 = jax.block_until_ready(smooth_l1_loss(logits, labels))

    # Case 3: non-lane-aligned element count (385 = 3*128 + 1) -> hybrid path.
    pred3 = jax.random.normal(k5, (5, 7, 11), dtype=jnp.float32)
    target3 = jax.random.normal(k6, (5, 7, 11), dtype=jnp.float32)
    loss3 = jax.block_until_ready(smooth_l1_loss(pred3, target3))

    # Reference check in plain JAX.
    def ref_smooth_l1(p, t):
        if p.ndim > 1 and t.ndim == 1:
            t = jax.nn.one_hot(t, p.shape[1], dtype=jnp.float32)
        d = p.astype(jnp.float32) - t.astype(jnp.float32)
        ad = jnp.abs(d)
        l = jnp.where(ad < BETA, 0.5 * d * d / BETA, ad - 0.5 * BETA)
        return jnp.mean(l)

    r1 = ref_smooth_l1(pred, target)
    r2 = ref_smooth_l1(logits, labels)
    r3 = ref_smooth_l1(pred3, target3)
    assert jnp.allclose(loss1, r1, rtol=1e-5, atol=1e-6), (loss1, r1)
    assert jnp.allclose(loss2, r2, rtol=1e-5, atol=1e-6), (loss2, r2)
    assert jnp.allclose(loss3, r3, rtol=1e-5, atol=1e-6), (loss3, r3)

    print("KERNEL_OK")
</pallas_src>

<mosaic_0001>
module attributes {stable_mosaic.version = 11 : i64} {
  func.func @_smooth_l1_partial_kernel(%arg0: i32, %arg1: i32, %arg2: memref<16x128xf32, #tpu.memory_space<vmem>>, %arg3: memref<16x128xf32, #tpu.memory_space<vmem>>, %arg4: memref<1x8x128xf32, #tpu.memory_space<vmem>>, %arg5: memref<8x128xf32, #tpu.memory_space<vmem>>) attributes {dimension_semantics = [#tpu.dimension_semantics<arbitrary>, #tpu.dimension_semantics<arbitrary>], iteration_bounds = array<i64: 1, 1>, scalar_prefetch = 0 : i64, scratch_operands = 1 : i64, tpu.core_type = #tpu.core_type<tc>, window_params = [{transform_indices = @transform_0, window_bounds = array<i64: 16, 128>}, {transform_indices = @transform_1, window_bounds = array<i64: 16, 128>}, {transform_indices = @transform_2, window_bounds = array<i64: 1, 8, 128>}]} {
    %c0_i32 = arith.constant 0 : i32
    %0 = arith.cmpi eq, %arg1, %c0_i32 : i32
    %1 = arith.extui %0 : i1 to i32
    %c0_i32_0 = arith.constant 0 : i32
    %2 = arith.cmpi ne, %1, %c0_i32_0 : i32
    scf.if %2 {
      %cst_12 = arith.constant 0.000000e+00 : f32
      %21 = vector.broadcast %cst_12 : f32 to vector<8x128xf32>
      %c0_13 = arith.constant 0 : index
      %c0_14 = arith.constant 0 : index
      %22 = vector.load %arg5[%c0_13, %c0_14] : memref<8x128xf32, #tpu.memory_space<vmem>>, vector<8x128xf32>
      tpu.vector_store %arg5[%c0_13, %c0_14], %21 {strides = array<i32>} : memref<8x128xf32, #tpu.memory_space<vmem>>, vector<8x128xf32>,
    } else {
    }
    %c0 = arith.constant 0 : index
    %c0_1 = arith.constant 0 : index
    %3 = vector.load %arg2[%c0, %c0_1] : memref<16x128xf32, #tpu.memory_space<vmem>>, vector<16x128xf32>
    %c0_2 = arith.constant 0 : index
    %c0_3 = arith.constant 0 : index
    %4 = vector.load %arg3[%c0_2, %c0_3] : memref<16x128xf32, #tpu.memory_space<vmem>>, vector<16x128xf32>
    %5 = arith.subf %3, %4 : vector<16x128xf32>
    %6 = math.absf %5 : vector<16x128xf32>
    %cst = arith.constant 1.000000e+00 : f32
    %7 = vector.broadcast %cst : f32 to vector<16x128xf32>
    %8 = arith.minimumf %6, %7 : vector<16x128xf32>
    %cst_4 = arith.constant 5.000000e-01 : f32
    %9 = vector.broadcast %cst_4 : f32 to vector<16x128xf32>
    %10 = arith.mulf %9, %8 : vector<16x128xf32>
    %11 = arith.subf %6, %10 : vector<16x128xf32>
    %12 = arith.mulf %8, %11 : vector<16x128xf32>
    %c0_5 = arith.constant 0 : index
    %c0_6 = arith.constant 0 : index
    %13 = vector.load %arg5[%c0_5, %c0_6] : memref<8x128xf32, #tpu.memory_space<vmem>>, vector<8x128xf32>
    %14 = vector.shape_cast %12 : vector<16x128xf32> to vector<2x8x128xf32>
    %cst_7 = arith.constant dense<0.000000e+00> : vector<8x128xf32>
    %15 = vector.multi_reduction <add>, %14, %cst_7 [0] : vector<2x8x128xf32> to vector<8x128xf32>
    %16 = arith.addf %13, %15 : vector<8x128xf32>
    %c0_8 = arith.constant 0 : index
    %c0_9 = arith.constant 0 : index
    %17 = vector.load %arg5[%c0_8, %c0_9] : memref<8x128xf32, #tpu.memory_space<vmem>>, vector<8x128xf32>
    tpu.vector_store %arg5[%c0_8, %c0_9], %16 {strides = array<i32>} : memref<8x128xf32, #tpu.memory_space<vmem>>, vector<8x128xf32>,
    %c0_i32_10 = arith.constant 0 : i32
    %18 = arith.cmpi eq, %arg1, %c0_i32_10 : i32
    %19 = arith.extui %18 : i1 to i32
    %c0_i32_11 = arith.constant 0 : i32
    %20 = arith.cmpi ne, %19, %c0_i32_11 : i32
    scf.if %20 {
      %c0_12 = arith.constant 0 : index
      %c0_13 = arith.constant 0 : index
      %21 = vector.load %arg5[%c0_12, %c0_13] : memref<8x128xf32, #tpu.memory_space<vmem>>, vector<8x128xf32>
      %c0_14 = arith.constant 0 : index
      %c0_15 = arith.constant 0 : index
      %c0_16 = arith.constant 0 : index
      %22 = vector.load %arg4[%c0_14, %c0_15, %c0_16] : memref<1x8x128xf32, #tpu.memory_space<vmem>>, vector<1x8x128xf32>
      %23 = vector.shape_cast %22 : vector<1x8x128xf32> to vector<8x128xf32>
      %24 = vector.shape_cast %21 : vector<8x128xf32> to vector<1x8x128xf32>
      tpu.vector_store %arg4[%c0_14, %c0_15, %c0_16], %24 {strides = array<i32>} : memref<1x8x128xf32, #tpu.memory_space<vmem>>, vector<1x8x128xf32>,
    } else {
    }
    return
  }
  func.func @transform_0(%arg0: i32, %arg1: i32) -> (i32, i32) {
    %c1_i32 = arith.constant 1 : i32
    %0 = arith.muli %arg0, %c1_i32 : i32
    %1 = arith.addi %0, %arg1 : i32
    %c0_i32 = arith.constant 0 : i32
    %2 = arith.minsi %1, %c0_i32 : i32
    %c0_i32_0 = arith.constant 0 : i32
    %c0_i32_1 = arith.constant 0 : i32
    return %2, %c0_i32_0 : i32, i32
  }
  func.func @transform_1(%arg0: i32, %arg1: i32) -> (i32, i32) {
    %c1_i32 = arith.constant 1 : i32
    %0 = arith.muli %arg0, %c1_i32 : i32
    %1 = arith.addi %0, %arg1 : i32
    %c0_i32 = arith.constant 0 : i32
    %2 = arith.minsi %1, %c0_i32 : i32
    %c0_i32_0 = arith.constant 0 : i32
    %c0_i32_1 = arith.constant 0 : i32
    return %2, %c0_i32_0 : i32, i32
  }
  func.func @transform_2(%arg0: i32, %arg1: i32) -> (i32, i32, i32) {
    %c0_i32 = arith.constant 0 : i32
    %c0_i32_0 = arith.constant 0 : i32
    %c0_i32_1 = arith.constant 0 : i32
    return %arg0, %c0_i32, %c0_i32_0 : i32, i32, i32
  }
}

</mosaic_0001>

<bundles_post_ra>
// kernel: tpu_custom_call.1
= control target key start
LH: loop header
LB: loop body
LE: loop exit
PB: predicated region body
PF: predicated region fallthrough
CT: control target
= control target key end

     0   :  { %7 = vsyncpa [#allocation4], 0  ;;  %s243_s0 = inlined_call_operand.hbm [shape: f32[16,128], index: 0, kind: input, shape index: {}]   ;;  %s244_s1 = inlined_call_operand.hbm [shape: f32[16,128], index: 1, kind: input, shape index: {}]   ;;  %s245_s2 = inlined_call_operand.hbm [shape: f32[1,8,128], index: 2, kind: output, shape index: {}]  }
   0x1   :  { %8 = vsyncpa [#allocation7], 0 }
   0x2   :  { %9 = vsyncpa [#allocation5], 0  ;;  %s187_s9 = smov [#allocation3]   ;;  %s115_s13 = scalar_lea.hbm %s243_s0, 256 }
   0x3   :  { %s21_s10 = sshll.u32 %s187_s9, 4  ;;  %p116_p0 = scmp.ne.s32.totalorder %s243_s0, %s115_s13  ;;  %s22_s10 = int_to_ptr.vmem [resolvable:$true] %s21_s10 }
   0x4   :  { %p119_p1 = scmp.lt.u32.totalorder %s115_s13, %s243_s0 }
   0x6   :  { %p121_p2 = pnand %p119_p1, %p116_p0 }
   0x8   :  { %124 = shalt.err (!%p121_p2)
}
   0x9   :  { %s125_s18 = scalar_lea.vmem %s22_s10, 256  ;;  %p130_p4 = scmp.lt.s32.totalorder %s22_s10, %s22_s10 }
   0xa   :  { %p126_p3 = scmp.ne.s32.totalorder %s22_s10, %s125_s18  ;;  %p131_p5 = scmp.lt.s32.totalorder %s125_s18, %s125_s18 }
   0xc   :  { %p132_p6 = por %p131_p5, %p130_p4 }
   0xe   :  { %p133_p7 = pnand %p132_p6, %p126_p3 }
  0x10   :  { %136 = shalt.err (!%p133_p7)
}
  0x11   :  { %s188_s19 = smov 128   ;;  %s189_s20 = smov 8  }
  0x12   :  { %27 = dma.hbm_to_vmem [thread:$0]  %s243_s0, 256, %s22_s10, [#allocation4], %s188_s19, %s188_s19, %s189_s20  }
  0x13   :  { %s190_s23 = smov [#allocation6]   ;;  %s137_s27 = scalar_lea.hbm %s244_s1, 256 }
  0x14   :  { %s39_s24 = sshll.u32 %s190_s23, 4  ;;  %p138_p8 = scmp.ne.s32.totalorder %s244_s1, %s137_s27  ;;  %s40_s24 = int_to_ptr.vmem [resolvable:$true] %s39_s24 }
  0x15   :  { %p141_p9 = scmp.lt.u32.totalorder %s137_s27, %s244_s1 }
  0x17   :  { %p143_p10 = pnand %p141_p9, %p138_p8 }
  0x19   :  { %146 = shalt.err (!%p143_p10)
}
  0x1a   :  { %s147_s4 = scalar_lea.vmem %s40_s24, 256  ;;  %p152_p12 = scmp.lt.s32.totalorder %s40_s24, %s40_s24 }
  0x1b   :  { %p148_p11 = scmp.ne.s32.totalorder %s40_s24, %s147_s4  ;;  %p153_p13 = scmp.lt.s32.totalorder %s147_s4, %s147_s4 }
  0x1d   :  { %p154_p0 = por %p153_p13, %p152_p12 }
  0x1f   :  { %p155_p1 = pnand %p154_p0, %p148_p11 }
  0x21   :  { %158 = shalt.err (!%p155_p1)
}
  0x22   :  { %45 = dma.hbm_to_vmem [thread:$0]  %s244_s1, 256, %s40_s24, [#allocation7], %s188_s19, %s188_s19, %s189_s20  }
  0x23   :  { %181 = dma.done.wait [#allocation4], 256  }
  0x24   :  { %182 = vsyncadd [#allocation4], 4294967040 }
  0x25   :  { %183 = dma.done.wait [#allocation7], 256  }
  0x26   :  { %184 = vsyncadd [#allocation7], 4294967040  ;;  %v65_v0 = vld [vmem:[#allocation3] sm:$0xff]  ;;  %v66_v1 = vld [vmem:[#allocation3 + $0x8] sm:$0xff]  ;;  %s191_s1 = smov [#allocation8]  }
  0x27   :  { %v67_v2 = vld [vmem:[#allocation6] sm:$0xff]  ;;  %v68_v3 = vld [vmem:[#allocation6 + $0x8] sm:$0xff]  ;;  %s96_s6 = sshll.u32 %s191_s1, 4  ;;  %s97_s6 = int_to_ptr.vmem [resolvable:$true] %s96_s6 }
  0x28   :  { %v69_v4 = vsub.f32 %v65_v0, %v67_v2  ;;  %v70_v5 = vsub.f32 %v66_v1, %v68_v3  ;;  %s159_s7 = scalar_lea.vmem %s97_s6, 128  ;;  %p164_p3 = scmp.lt.s32.totalorder %s97_s6, %s97_s6 }
  0x29   :  { %p160_p2 = scmp.ne.s32.totalorder %s97_s6, %s159_s7  ;;  %p165_p4 = scmp.lt.s32.totalorder %s159_s7, %s159_s7 }
  0x2a   :  { %v71_v6 = vand.u32 2147483647, %v69_v4  ;;  %v72_v7 = vand.u32 2147483647, %v70_v5 }
  0x2b   :  { %p166_p5 = por %p165_p4, %p164_p3 }
  0x2c   :  { %v73_v8 = vmin.f32 %v71_v6, 1.0  ;;  %v74_v9 = vmin.f32 %v72_v7, 1.0 }
  0x2d   :  { %p167_p6 = pnand %p166_p5, %p160_p2 }
  0x2e   :  { %v75_v10 = vmul.f32 0.5, %v73_v8  ;;  %v76_v11 = vmul.f32 0.5, %v74_v9 }
  0x30   :  { %v77_v12 = vsub.f32 %v71_v6, %v75_v10  ;;  %v78_v13 = vsub.f32 %v72_v7, %v76_v11 }
  0x32   :  { %v79_v14 = vmul.f32 %v77_v12, %v73_v8  ;;  %v80_v15 = vmul.f32 %v78_v13, %v74_v9 }
  0x34   :  { %v82_v16 = vadd.f32 %v80_v15, %v79_v14 }
  0x36   :  { %89 = vst [vmem:[#allocation8] sm:$0xff] %v82_v16 }
  0x37   :  { %170 = shalt.err (!%p167_p6)
}
  0x38   :  { %s171_s10 = scalar_lea.hbm %s245_s2, 128 }
  0x39   :  { %p172_p7 = scmp.ne.s32.totalorder %s245_s2, %s171_s10  ;;  %p175_p8 = scmp.lt.u32.totalorder %s171_s10, %s245_s2 }
  0x3b   :  { %p177_p9 = pnand %p175_p8, %p172_p7 }
  0x3d   :  { %180 = shalt.err (!%p177_p9)
}
  0x3e   :  { %99 = dma.vmem_to_hbm [thread:$0]  %s97_s6, 128, %s245_s2, [#allocation5]  }
  0x3f   :  { %185 = dma.done.wait [#allocation5], 128  }
  0x40   :  { %186 = vsyncadd [#allocation5], 4294967168 }
  0x41   :  { %103 = vsyncpa [#allocation4], 1 }
  0x42   :  { %104 = vsyncpa [#allocation7], 1 }
  0x43   :  { %105 = vsyncpa [#allocation5], 1 }

</bundles_post_ra>
